<compile_context>
chip_gen: v5e
topology: v5e:2x2
jax: 0.10.0
libtpu: 0.0.40
codegen_flags: <defaults>
</compile_context>

<pallas_src>
import functools

import jax
import jax.numpy as jnp
from jax import lax
from jax.experimental import pallas as pl
from jax.experimental.pallas import tpu as pltpu


def _soft_similarity_kernel(s_ref, ui_ref, uj_ref, o_ref, *, code_length):
    j = pl.program_id(1)

    # Output block for grid row `i` is resident across the j axis -> zero it
    # on the first j step.
    @pl.when(j == 0)
    def _():
        o_ref[...] = jnp.zeros_like(o_ref)

    # theta tile = Ui @ Uj.T on the MXU: contract dim 1 of both operands, so
    # no explicit transpose (and no XLU contention with the epilogue).
    theta = lax.dot_general(
        ui_ref[...],
        uj_ref[...],
        dimension_numbers=(((1,), (1,)), ((), ())),
        preferred_element_type=jnp.float32,
    )

    diff = theta - jnp.float32(code_length) * s_ref[...]
    d2 = diff * diff

    # Partial reduce (tm, tn) -> (8, tn): the reshape keeps the lane dim (tn)
    # and groups sublanes in 8s, so it is layout-free, and the leading-axis
    # sum is pure VPU vreg adds.  The final scalar reduce happens once, in
    # the wrapper.
    tm, tn = d2.shape
    o_ref[...] += d2.reshape(tm // 8, 8, tn).sum(axis=0)[None, :, :]


def _pick_tile(n, preferred, multiple):
    """Largest tile <= preferred that divides n and is a multiple of `multiple`,
    falling back to the full extent n (always legal for BlockSpec)."""
    t = min(preferred, n)
    while t >= multiple:
        if n % t == 0 and t % multiple == 0:
            return t
        t -= multiple
    return n


def soft_similarity_loss(
    soft_similarity,
    U,
    code_length,
    *,
    tm=512,
    tn=512,
    use_bf16_mxu=True,
):
    """Pallas implementation of SoftSimilarity.forward.

    soft_similarity: [N, N] float
    U:               [N, D] float  (D == code_length)
    Returns a scalar f32 loss: mean((U @ U.T - code_length * S)^2).
    """
    N, D = U.shape
    assert soft_similarity.shape == (N, N)

    # tm needs to be a multiple of 8 for the in-kernel sublane-group reduce;
    # tn wants to be a multiple of 128 so the S tile / output are lane-dense.
    tm = _pick_tile(N, tm, 8)
    tn = _pick_tile(N, tn, 128)
    assert N % tm == 0 and N % tn == 0, "N must tile evenly by (tm, tn)"
    assert tm % 8 == 0, "tm must be a multiple of 8 (sublane grouping)"
    # TODO(synk): add a K reduction grid axis if code_length ever grows beyond
    # what comfortably fits in VMEM (typical hashing code lengths are <= 512,
    # so the whole D dimension is kept per step here).

    soft_similarity = soft_similarity.astype(jnp.float32)
    u_dtype = jnp.bfloat16 if use_bf16_mxu else jnp.float32
    u_mxu = U.astype(u_dtype)

    ni, nj = N // tm, N // tn
    grid = (ni, nj)

    u_bytes = 2 if use_bf16_mxu else 4
    cost = pl.CostEstimate(
        flops=2 * N * N * D + 3 * N * N,
        transcendentals=0,
        bytes_accessed=(
            4 * N * N                      # soft_similarity, read once
            + u_bytes * N * D              # Ui block-rows (constant across j, no re-DMA)
            + u_bytes * N * D * ni         # Uj block-cols re-read per i
            + 4 * ni * 8 * tn              # lane-dense partial outputs
        ),
    )

    partials = pl.pallas_call(
        functools.partial(_soft_similarity_kernel, code_length=float(code_length)),
        out_shape=jax.ShapeDtypeStruct((ni, 8, tn), jnp.float32),
        grid_spec=pltpu.PrefetchScalarGridSpec(
            num_scalar_prefetch=0,
            grid=grid,
            in_specs=[
                # soft_similarity tile for output block (i, j)
                pl.BlockSpec((tm, tn), lambda i, j: (i, j)),
                # U rows for block-row i (full code dimension)
                pl.BlockSpec((tm, D), lambda i, j: (i, 0)),
                # U rows for block-col j (full code dimension)
                pl.BlockSpec((tn, D), lambda i, j: (j, 0)),
            ],
            # Lane-dense per-row-block partial sums, resident across j.
            out_specs=pl.BlockSpec((1, 8, tn), lambda i, j: (i, 0, 0)),
        ),
        compiler_params=pltpu.CompilerParams(
            # i blocks are independent -> can shard across v7x's two cores;
            # j is the accumulation axis over the resident output block.
            dimension_semantics=("parallel", "arbitrary"),
            vmem_limit_bytes=64 * 1024 * 1024,
        ),
        cost_estimate=cost,
    )(soft_similarity, u_mxu, u_mxu)

    return jnp.sum(partials) / jnp.float32(N * N)


if __name__ == "__main__":
    # Small deterministic example: N samples with code_length-bit relaxed codes.
    N = 256
    code_length = 128
    key = jax.random.PRNGKey(0)
    k1, k2 = jax.random.split(key)

    # Continuous (tanh-relaxed) codes U in [-1, 1], soft similarity in [0, 1].
    U = jnp.tanh(jax.random.normal(k1, (N, code_length), dtype=jnp.float32))
    soft_similarity = jax.random.uniform(k2, (N, N), dtype=jnp.float32)

    loss = soft_similarity_loss(soft_similarity, U, code_length)
    loss = jax.block_until_ready(loss)

    # Reference in plain JAX (f32) for a sanity check.  Tolerance is loosened
    # slightly because the kernel feeds the MXU bf16 operands (f32 accumulate).
    theta_ref = U @ U.T
    ref = jnp.mean((theta_ref - code_length * soft_similarity) ** 2)
    ref = jax.block_until_ready(ref)

    assert jnp.allclose(loss, ref, rtol=1e-2, atol=1e-2), (loss, ref)
    print("KERNEL_OK")
</pallas_src>

<mosaic_0001>
module attributes {stable_mosaic.version = 11 : i64} {
  func.func @_soft_similarity_kernel(%arg0: i32, %arg1: i32, %arg2: memref<256x256xf32, #tpu.memory_space<vmem>>, %arg3: memref<256x128xbf16, #tpu.memory_space<vmem>>, %arg4: memref<256x128xbf16, #tpu.memory_space<vmem>>, %arg5: memref<1x8x256xf32, #tpu.memory_space<vmem>>) attributes {dimension_semantics = [#tpu.dimension_semantics<parallel>, #tpu.dimension_semantics<arbitrary>], iteration_bounds = array<i64: 1, 1>, scalar_prefetch = 0 : i64, scratch_operands = 0 : i64, tpu.core_type = #tpu.core_type<tc>, window_params = [{transform_indices = @transform_0, window_bounds = array<i64: 256, 256>}, {transform_indices = @transform_1, window_bounds = array<i64: 256, 128>}, {transform_indices = @transform_2, window_bounds = array<i64: 256, 128>}, {transform_indices = @transform_3, window_bounds = array<i64: 1, 8, 256>}]} {
    %c0_i32 = arith.constant 0 : i32
    %0 = arith.cmpi eq, %arg1, %c0_i32 : i32
    %1 = arith.extui %0 : i1 to i32
    %c0_i32_0 = arith.constant 0 : i32
    %2 = arith.cmpi ne, %1, %c0_i32_0 : i32
    scf.if %2 {
      %cst_14 = arith.constant 0.000000e+00 : f32
      %17 = vector.broadcast %cst_14 : f32 to vector<1x8x256xf32>
      %c0_15 = arith.constant 0 : index
      %c0_16 = arith.constant 0 : index
      %c0_17 = arith.constant 0 : index
      %18 = vector.load %arg5[%c0_15, %c0_16, %c0_17] : memref<1x8x256xf32, #tpu.memory_space<vmem>>, vector<1x8x256xf32>
      tpu.vector_store %arg5[%c0_15, %c0_16, %c0_17], %17 {strides = array<i32>} : memref<1x8x256xf32, #tpu.memory_space<vmem>>, vector<1x8x256xf32>,
    } else {
    }
    %c0 = arith.constant 0 : index
    %c0_1 = arith.constant 0 : index
    %3 = vector.load %arg3[%c0, %c0_1] : memref<256x128xbf16, #tpu.memory_space<vmem>>, vector<256x128xbf16>
    %c0_2 = arith.constant 0 : index
    %c0_3 = arith.constant 0 : index
    %4 = vector.load %arg4[%c0_2, %c0_3] : memref<256x128xbf16, #tpu.memory_space<vmem>>, vector<256x128xbf16>
    %cst = arith.constant dense<0.000000e+00> : vector<256x256xf32>
    %5 = tpu.matmul %3, %4, %cst {dimension_numbers = #tpu.dot_dimension_numbers<[1], [1], [0], [0], [0, 0, 1, 0], [], []>} : vector<256x128xbf16>, vector<256x128xbf16>, vector<256x256xf32> -> vector<256x256xf32>
    %c0_4 = arith.constant 0 : index
    %c0_5 = arith.constant 0 : index
    %6 = vector.load %arg2[%c0_4, %c0_5] : memref<256x256xf32, #tpu.memory_space<vmem>>, vector<256x256xf32>
    %cst_6 = arith.constant 1.280000e+02 : f32
    %7 = vector.broadcast %cst_6 : f32 to vector<256x256xf32>
    %8 = arith.mulf %7, %6 : vector<256x256xf32>
    %9 = arith.subf %5, %8 : vector<256x256xf32>
    %10 = arith.mulf %9, %9 : vector<256x256xf32>
    %c0_7 = arith.constant 0 : index
    %c0_8 = arith.constant 0 : index
    %c0_9 = arith.constant 0 : index
    %11 = vector.load %arg5[%c0_7, %c0_8, %c0_9] : memref<1x8x256xf32, #tpu.memory_space<vmem>>, vector<1x8x256xf32>
    %12 = vector.shape_cast %10 : vector<256x256xf32> to vector<32x8x256xf32>
    %cst_10 = arith.constant dense<0.000000e+00> : vector<8x256xf32>
    %13 = vector.multi_reduction <add>, %12, %cst_10 [0] : vector<32x8x256xf32> to vector<8x256xf32>
    %14 = vector.shape_cast %13 : vector<8x256xf32> to vector<1x8x256xf32>
    %15 = arith.addf %11, %14 : vector<1x8x256xf32>
    %c0_11 = arith.constant 0 : index
    %c0_12 = arith.constant 0 : index
    %c0_13 = arith.constant 0 : index
    %16 = vector.load %arg5[%c0_11, %c0_12, %c0_13] : memref<1x8x256xf32, #tpu.memory_space<vmem>>, vector<1x8x256xf32>
    tpu.vector_store %arg5[%c0_11, %c0_12, %c0_13], %15 {strides = array<i32>} : memref<1x8x256xf32, #tpu.memory_space<vmem>>, vector<1x8x256xf32>,
    return
  }
  func.func @transform_0(%arg0: i32, %arg1: i32) -> (i32, i32) {
    %c0_i32 = arith.constant 0 : i32
    return %arg0, %arg1 : i32, i32
  }
  func.func @transform_1(%arg0: i32, %arg1: i32) -> (i32, i32) {
    %c0_i32 = arith.constant 0 : i32
    %c0_i32_0 = arith.constant 0 : i32
    return %arg0, %c0_i32 : i32, i32
  }
  func.func @transform_2(%arg0: i32, %arg1: i32) -> (i32, i32) {
    %c0_i32 = arith.constant 0 : i32
    %c0_i32_0 = arith.constant 0 : i32
    return %arg1, %c0_i32 : i32, i32
  }
  func.func @transform_3(%arg0: i32, %arg1: i32) -> (i32, i32, i32) {
    %c0_i32 = arith.constant 0 : i32
    %c0_i32_0 = arith.constant 0 : i32
    %c0_i32_1 = arith.constant 0 : i32
    return %arg0, %c0_i32, %c0_i32_0 : i32, i32, i32
  }
}

</mosaic_0001>

<bundles_post_ra>
// kernel: tpu_custom_call.1
= control target key start
LH: loop header
LB: loop body
LE: loop exit
PB: predicated region body
PF: predicated region fallthrough
CT: control target
= control target key end

     0   :  { %8 = vsyncpa [#allocation3], 0  ;;  %s1279_s0 = inlined_call_operand.hbm [shape: f32[256,256], index: 0, kind: input, shape index: {}]   ;;  %s1280_s1 = inlined_call_operand.hbm [shape: bf16[256,128], index: 1, kind: input, shape index: {}]   ;;  %s1281_s2 = inlined_call_operand.hbm [shape: bf16[256,128], index: 2, kind: input, shape index: {}]   ;;  %s1282_s3 = inlined_call_operand.hbm [shape: f32[1,8,256], index: 3, kind: output, shape index: {}]  }
   0x1   :  { %9 = vsyncpa [#allocation6], 0  ;;  %s28_s14 = sshll.u32 %s1280_s1, 4  ;;  %s29_s14 = int_to_ptr.hbm [resolvable:$true] %s28_s14 }
   0x2   :  { %10 = vsyncpa [#allocation4], 0  ;;  %s1131_s15 = smov [#allocation5]   ;;  %s15_s19 = sshll.u32 %s1279_s0, 4  ;;  %s16_s19 = int_to_ptr.hbm [resolvable:$true] %s15_s19 }
   0x3   :  { %s30_s16 = sshll.u32 %s1131_s15, 4  ;;  %s1132_s20 = smov 64   ;;  %s31_s16 = int_to_ptr.vmem [resolvable:$true] %s30_s16 }
   0x4   :  { %s1133_s21 = smov 4   ;;  %s1134_s22 = smov [#allocation2]  }
   0x5   :  { %36 = dma.hbm_to_vmem [thread:$0]  %s29_s14, 2048, %s31_s16, [#allocation6], %s1132_s20, %s1132_s20, %s1133_s21  }
   0x6   :  { %s17_s23 = sshll.u32 %s1134_s22, 4  ;;  %s1135_s24 = smov 256   ;;  %s18_s23 = int_to_ptr.vmem [resolvable:$true] %s17_s23 }
   0x7   :  { %s1136_s25 = smov 16   ;;  %s41_s27 = sshll.u32 %s1281_s2, 4  ;;  %s42_s27 = int_to_ptr.hbm [resolvable:$true] %s41_s27 }
   0x8   :  { %23 = dma.hbm_to_vmem [thread:$0]  %s16_s19, 8192, %s18_s23, [#allocation3], %s1135_s24, %s1135_s24, %s1136_s25  }
   0x9   :  { %s1137_s28 = smov [#allocation7]  }
   0xa   :  { %s43_s29 = sshll.u32 %s1137_s28, 4  ;;  %s44_s29 = int_to_ptr.vmem [resolvable:$true] %s43_s29 }
   0xb   :  { %49 = dma.hbm_to_vmem [thread:$0]  %s42_s27, 2048, %s44_s29, [#allocation6], %s1132_s20, %s1132_s20, %s1133_s21  }
   0xc   :  { %1125 = dma.done.wait [#allocation3], 8192  }
   0xd   :  { %1126 = vsyncadd [#allocation3], 4294959104 }
   0xe   :  { %1127 = dma.done.wait [#allocation6], 4096  }
   0xf   :  { %1128 = vsyncadd [#allocation6], 4294963200  ;;  %v995_v0 = vld [vmem:[#allocation7 + $0x38] sm:$0xff]  ;;  %v994_v2 = vld [vmem:[#allocation7 + $0x30] sm:$0xff]  ;;  %s1138_s0 = smov [#allocation8]   ;;  %s833_s5 = sshll.u32 %s1282_s3, 4  ;;  %s834_s5 = int_to_ptr.hbm [resolvable:$true] %s833_s5 }
  0x10   :  { %v1003_v1 = vld [vmem:[#allocation7 + $0x78] sm:$0xff]  ;;  %324 = vmatpush.bf16.xpose.msra.mxu0 %v995_v0  ;;  %1004 = vmatpush.bf16.xpose.msra.mxu2 %v995_v0  ;;  %v1002_v3 = vld [vmem:[#allocation7 + $0x70] sm:$0xff]  ;;  %v993_v4 = vld [vmem:[#allocation7 + $0x28] sm:$0xff]  ;;  %s831_s2 = sshll.u32 %s1138_s0, 4  ;;  %s832_s2 = int_to_ptr.vmem [resolvable:$true] %s831_s2 }
  0x11   :  { %413 = vmatpush.bf16.xpose.msra.mxu1 %v1003_v1  ;;  %1012 = vmatpush.bf16.xpose.msra.mxu3 %v1003_v1  ;;  %v1001_v5 = vld [vmem:[#allocation7 + $0x68] sm:$0xff]  ;;  %v992_v6 = vld [vmem:[#allocation7 + $0x20] sm:$0xff]  ;;  %v991_v8 = vld [vmem:[#allocation7 + $0x18] sm:$0xff] }
  0x12   :  { %v1000_v7 = vld [vmem:[#allocation7 + $0x60] sm:$0xff]  ;;  %v999_v9 = vld [vmem:[#allocation7 + $0x58] sm:$0xff]  ;;  %v990_v10 = vld [vmem:[#allocation7 + $0x10] sm:$0xff] }
  0x13   :  { %v998_v11 = vld [vmem:[#allocation7 + $0x50] sm:$0xff]  ;;  %v989_v12 = vld [vmem:[#allocation7 + $0x8] sm:$0xff]  ;;  %v988_v14 = vld [vmem:[#allocation7] sm:$0xff] }
  0x14   :  { %v997_v13 = vld [vmem:[#allocation7 + $0x48] sm:$0xff]  ;;  %v996_v15 = vld [vmem:[#allocation7 + $0x40] sm:$0xff]  ;;  %v974_v20 = vld [vmem:[#allocation5 + $0x10] sm:$0xff] }
  0x15   :  { %v972_v16 = vld [vmem:[#allocation5] sm:$0xff]  ;;  %v973_v18 = vld [vmem:[#allocation5 + $0x8] sm:$0xff]  ;;  %v982_v21 = vld [vmem:[#allocation5 + $0x50] sm:$0xff] }
  0x16   :  { %v980_v17 = vld [vmem:[#allocation5 + $0x40] sm:$0xff]  ;;  %v981_v19 = vld [vmem:[#allocation5 + $0x48] sm:$0xff]  ;;  %v975_v22 = vld [vmem:[#allocation5 + $0x18] sm:$0xff] }
  0x17   :  { %v983_v23 = vld [vmem:[#allocation5 + $0x58] sm:$0xff]  ;;  %v976_v24 = vld [vmem:[#allocation5 + $0x20] sm:$0xff]  ;;  %v977_v26 = vld [vmem:[#allocation5 + $0x28] sm:$0xff] }
  0x18   :  { %325 = vmatpush.bf16.xpose.msra.mxu0 %v994_v2  ;;  %1005 = vmatpush.bf16.xpose.msra.mxu2 %v994_v2  ;;  %v984_v25 = vld [vmem:[#allocation5 + $0x60] sm:$0xff]  ;;  %v985_v27 = vld [vmem:[#allocation5 + $0x68] sm:$0xff]  ;;  %v978_v28 = vld [vmem:[#allocation5 + $0x30] sm:$0xff] }
  0x19   :  { %414 = vmatpush.bf16.xpose.msra.mxu1 %v1002_v3  ;;  %1013 = vmatpush.bf16.xpose.msra.mxu3 %v1002_v3  ;;  %v986_v29 = vld [vmem:[#allocation5 + $0x70] sm:$0xff]  ;;  %v979_v30 = vld [vmem:[#allocation5 + $0x38] sm:$0xff]  ;;  %v502_v33 = vld [vmem:[#allocation2] sm:$0xff] }
  0x1a   :  { %v987_v31 = vld [vmem:[#allocation5 + $0x78] sm:$0xff]  ;;  %v503_v35 = vld [vmem:[#allocation2 + $0x8] sm:$0xff]  ;;  %v504_v36 = vld [vmem:[#allocation2 + $0x10] sm:$0xff]  ;;  %v566_v38 = vmul.f32 128.0, %v502_v33 }
  0x1b   :  { %v505_v37 = vld [vmem:[#allocation2 + $0x18] sm:$0xff]  ;;  %v567_v39 = vmul.f32 128.0, %v503_v35  ;;  %v568_v40 = vmul.f32 128.0, %v504_v36  ;;  %v506_v50 = vld [vmem:[#allocation2 + $0x20] sm:$0xff]  ;;  %v507_v51 = vld [vmem:[#allocation2 + $0x28] sm:$0xff] }
  0x1c   :  { %v569_v41 = vmul.f32 128.0, %v505_v37  ;;  %v570_v58 = vmul.f32 128.0, %v506_v50  ;;  %v571_v59 = vmul.f32 128.0, %v507_v51  ;;  %v508_v2 = vld [vmem:[#allocation2 + $0x30] sm:$0xff]  ;;  %v509_v3 = vld [vmem:[#allocation2 + $0x38] sm:$0xff] }
  0x20   :  { %326 = vmatpush.bf16.xpose.msra.mxu0 %v993_v4  ;;  %1006 = vmatpush.bf16.xpose.msra.mxu2 %v993_v4 }
  0x21   :  { %415 = vmatpush.bf16.xpose.msra.mxu1 %v1001_v5  ;;  %1014 = vmatpush.bf16.xpose.msra.mxu3 %v1001_v5 }
  0x28   :  { %327 = vmatpush.bf16.xpose.msra.mxu0 %v992_v6  ;;  %1007 = vmatpush.bf16.xpose.msra.mxu2 %v992_v6 }
  0x29   :  { %416 = vmatpush.bf16.xpose.msra.mxu1 %v1000_v7  ;;  %1015 = vmatpush.bf16.xpose.msra.mxu3 %v1000_v7 }
  0x30   :  { %328 = vmatpush.bf16.xpose.msra.mxu0 %v991_v8  ;;  %1008 = vmatpush.bf16.xpose.msra.mxu2 %v991_v8  ;;  %v572_v8 = vmul.f32 128.0, %v508_v2  ;;  %v514_v2 = vld [vmem:[#allocation2 + $0x60] sm:$0xff] }
  0x31   :  { %417 = vmatpush.bf16.xpose.msra.mxu1 %v999_v9  ;;  %1016 = vmatpush.bf16.xpose.msra.mxu3 %v999_v9  ;;  %v573_v9 = vmul.f32 128.0, %v509_v3  ;;  %v515_v3 = vld [vmem:[#allocation2 + $0x68] sm:$0xff] }
  0x38   :  { %329 = vmatpush.bf16.xpose.msra.mxu0 %v990_v10  ;;  %1009 = vmatpush.bf16.xpose.msra.mxu2 %v990_v10 }
  0x39   :  { %418 = vmatpush.bf16.xpose.msra.mxu1 %v998_v11  ;;  %1017 = vmatpush.bf16.xpose.msra.mxu3 %v998_v11 }
  0x40   :  { %330 = vmatpush.bf16.xpose.msra.mxu0 %v989_v12  ;;  %1010 = vmatpush.bf16.xpose.msra.mxu2 %v989_v12 }
  0x41   :  { %419 = vmatpush.bf16.xpose.msra.mxu1 %v997_v13  ;;  %1018 = vmatpush.bf16.xpose.msra.mxu3 %v997_v13 }
  0x48   :  { %331 = vmatpush.bf16.xpose.msra.mxu0 %v988_v14  ;;  %1011 = vmatpush.bf16.xpose.msra.mxu2 %v988_v14 }
  0x49   :  { %420 = vmatpush.bf16.xpose.msra.mxu1 %v996_v15  ;;  %1019 = vmatpush.bf16.xpose.msra.mxu3 %v996_v15 }
  0x4f   :  { %332 = vmatmul.bf16.vlgmr.msra.gmra.mxu0 %v972_v16  ;;  %372 = vmatmul.bf16.vlgmr.msra.gmra.mxu2 %v980_v17 }
  0x50   :  { %421 = vmatmul.bf16.vlgmr.msra.gmra.mxu1 %v972_v16  ;;  %461 = vmatmul.bf16.vlgmr.msra.gmra.mxu3 %v980_v17  ;;  %v510_v16 = vld [vmem:[#allocation2 + $0x40] sm:$0xff]  ;;  %v511_v17 = vld [vmem:[#allocation2 + $0x48] sm:$0xff] }
  0x5f   :  { %337 = vmatmul.bf16.gmra.mxu0 %v973_v18  ;;  %377 = vmatmul.bf16.gmra.mxu2 %v981_v19 }
  0x60   :  { %426 = vmatmul.bf16.gmra.mxu1 %v973_v18  ;;  %466 = vmatmul.bf16.gmra.mxu3 %v981_v19 }
  0x6f   :  { %342 = vmatmul.bf16.gmra.mxu0 %v974_v20  ;;  %382 = vmatmul.bf16.gmra.mxu2 %v982_v21 }
  0x70   :  { %431 = vmatmul.bf16.gmra.mxu1 %v974_v20  ;;  %471 = vmatmul.bf16.gmra.mxu3 %v982_v21 }
  0x7f   :  { %347 = vmatmul.bf16.gmra.mxu0 %v975_v22  ;;  %387 = vmatmul.bf16.gmra.mxu2 %v983_v23 }
  0x80   :  { %436 = vmatmul.bf16.gmra.mxu1 %v975_v22  ;;  %476 = vmatmul.bf16.gmra.mxu3 %v983_v23  ;;  %v574_v22 = vmul.f32 128.0, %v510_v16  ;;  %v575_v23 = vmul.f32 128.0, %v511_v17 }
  0x8f   :  { %352 = vmatmul.bf16.gmra.mxu0 %v976_v24  ;;  %392 = vmatmul.bf16.gmra.mxu2 %v984_v25 }
  0x90   :  { %441 = vmatmul.bf16.gmra.mxu1 %v976_v24  ;;  %481 = vmatmul.bf16.gmra.mxu3 %v984_v25 }
  0x9f   :  { %357 = vmatmul.bf16.gmra.mxu0 %v977_v26  ;;  %397 = vmatmul.bf16.gmra.mxu2 %v985_v27 }
  0xa0   :  { %446 = vmatmul.bf16.gmra.mxu1 %v977_v26  ;;  %486 = vmatmul.bf16.gmra.mxu3 %v985_v27 }
  0xaf   :  { %362 = vmatmul.bf16.gmra.mxu0 %v978_v28  ;;  %402 = vmatmul.bf16.gmra.mxu2 %v986_v29 }
  0xb0   :  { %451 = vmatmul.bf16.gmra.mxu1 %v978_v28  ;;  %491 = vmatmul.bf16.gmra.mxu3 %v986_v29 }
  0xbf   :  { %367 = vmatmul.bf16.gmra.mxu0 %v979_v30  ;;  %407 = vmatmul.bf16.gmra.mxu2 %v987_v31 }
  0xc0   :  { %456 = vmatmul.bf16.gmra.mxu1 %v979_v30  ;;  %496 = vmatmul.bf16.gmra.mxu3 %v987_v31 }
  0xcc   :  { %v333_v32 = vpop.f32.mrf.mxu0 }
  0xcd   :  { %v422_v34 = vpop.f32.mrf.mxu1  ;;  %v630_v42 = vsub.f32 %v333_v32, %v566_v38 }
  0xce   :  { %v631_v43 = vsub.f32 %v422_v34, %v567_v39 }
  0xcf   :  { %v694_v52 = vmul.f32 %v630_v42, %v630_v42 }
  0xd0   :  { %v695_v53 = vmul.f32 %v631_v43, %v631_v43 }
  0xd2   :  { %v1168_v44 = vpop.f32.mrf.mxu2 }
  0xd3   :  { %v1170_v45 = vpop.f32.mrf.mxu3 }
  0xd4   :  { %v335_v46 = vpop.f32.mrf.mxu0 }
  0xd5   :  { %v424_v47 = vpop.f32.mrf.mxu1  ;;  %v632_v48 = vsub.f32 %v335_v46, %v568_v40 }
  0xd6   :  { %v633_v49 = vsub.f32 %v424_v47, %v569_v41 }
  0xd7   :  { %v696_v54 = vmul.f32 %v632_v48, %v632_v48 }
  0xd8   :  { %v697_v55 = vmul.f32 %v633_v49, %v633_v49 }
  0xd9   :  { %v760_v56 = vadd.f32 %v696_v54, %v694_v52 }
  0xda   :  { %v791_v57 = vadd.f32 %v697_v55, %v695_v53  ;;  %v1172_v60 = vpop.f32.mrf.mxu2 }
  0xdb   :  { %v1174_v61 = vpop.f32.mrf.mxu3 }
  0xdc   :  { %v338_v62 = vpop.f32.mrf.mxu0 }
  0xdd   :  { %v427_v63 = vpop.f32.mrf.mxu1  ;;  %v634_v0 = vsub.f32 %v338_v62, %v570_v58  ;;  %v512_v62 = vld [vmem:[#allocation2 + $0x50] sm:$0xff] }
  0xde   :  { %v635_v1 = vsub.f32 %v427_v63, %v571_v59  ;;  %v513_v63 = vld [vmem:[#allocation2 + $0x58] sm:$0xff] }
  0xdf   :  { %v698_v4 = vmul.f32 %v634_v0, %v634_v0 }
  0xe0   :  { %v699_v5 = vmul.f32 %v635_v1, %v635_v1 }
  0xe1   :  { %v761_v6 = vadd.f32 %v760_v56, %v698_v4  ;;  %v576_v4 = vmul.f32 128.0, %v512_v62 }
  0xe2   :  { %v792_v7 = vadd.f32 %v791_v57, %v699_v5  ;;  %v1176_v10 = vpop.f32.mrf.mxu2  ;;  %v577_v5 = vmul.f32 128.0, %v513_v63 }
  0xe3   :  { %v1178_v11 = vpop.f32.mrf.mxu3 }
  0xe4   :  { %v340_v12 = vpop.f32.mrf.mxu0 }
  0xe5   :  { %v429_v13 = vpop.f32.mrf.mxu1  ;;  %v636_v14 = vsub.f32 %v340_v12, %v572_v8  ;;  %v516_v8 = vld [vmem:[#allocation2 + $0x70] sm:$0xff] }
  0xe6   :  { %v637_v15 = vsub.f32 %v429_v13, %v573_v9  ;;  %v517_v9 = vld [vmem:[#allocation2 + $0x78] sm:$0xff]  ;;  %v580_v16 = vmul.f32 128.0, %v516_v8  ;;  %v524_v8 = vld [vmem:[#allocation2 + $0xb0] sm:$0xff] }
  0xe7   :  { %v700_v18 = vmul.f32 %v636_v14, %v636_v14  ;;  %v518_v14 = vld [vmem:[#allocation2 + $0x80] sm:$0xff]  ;;  %v581_v17 = vmul.f32 128.0, %v517_v9  ;;  %v525_v9 = vld [vmem:[#allocation2 + $0xb8] sm:$0xff] }
  0xe8   :  { %v701_v19 = vmul.f32 %v637_v15, %v637_v15  ;;  %v519_v15 = vld [vmem:[#allocation2 + $0x88] sm:$0xff] }
  0xe9   :  { %v762_v20 = vadd.f32 %v761_v6, %v700_v18  ;;  %v578_v6 = vmul.f32 128.0, %v514_v2 }
  0xea   :  { %v793_v21 = vadd.f32 %v792_v7, %v701_v19  ;;  %v1180_v24 = vpop.f32.mrf.mxu2  ;;  %v579_v7 = vmul.f32 128.0, %v515_v3 }
  0xeb   :  { %v1182_v25 = vpop.f32.mrf.mxu3 }
  0xec   :  { %v343_v26 = vpop.f32.mrf.mxu0 }
  0xed   :  { %v432_v27 = vpop.f32.mrf.mxu1  ;;  %v638_v28 = vsub.f32 %v343_v26, %v574_v22  ;;  %v520_v22 = vld [vmem:[#allocation2 + $0x90] sm:$0xff]  ;;  %v582_v26 = vmul.f32 128.0, %v518_v14 }
  0xee   :  { %v639_v29 = vsub.f32 %v432_v27, %v575_v23  ;;  %v521_v23 = vld [vmem:[#allocation2 + $0x98] sm:$0xff]  ;;  %v583_v27 = vmul.f32 128.0, %v519_v15  ;;  %v584_v2 = vmul.f32 128.0, %v520_v22 }
  0xef   :  { %v702_v30 = vmul.f32 %v638_v28, %v638_v28  ;;  %v585_v3 = vmul.f32 128.0, %v521_v23 }
  0xf0   :  { %v703_v31 = vmul.f32 %v639_v29, %v639_v29 }
  0xf1   :  { %v1184_v32 = vadd.f32 %v762_v20, %v702_v30 }
  0xf2   :  { %v1186_v33 = vadd.f32 %v793_v21, %v703_v31  ;;  %v1188_v34 = vpop.f32.mrf.mxu2 }
  0xf3   :  { %v1190_v35 = vpop.f32.mrf.mxu3 }
  0xf4   :  { %v345_v36 = vpop.f32.mrf.mxu0 }
  0xf5   :  { %v434_v37 = vpop.f32.mrf.mxu1  ;;  %v640_v12 = vsub.f32 %v345_v36, %v576_v4  ;;  %v522_v36 = vld [vmem:[#allocation2 + $0xa0] sm:$0xff] }
  0xf6   :  { %v641_v13 = vsub.f32 %v434_v37, %v577_v5  ;;  %v523_v37 = vld [vmem:[#allocation2 + $0xa8] sm:$0xff] }
  0xf7   :  { %v704_v30 = vmul.f32 %v640_v12, %v640_v12 }
  0xf8   :  { %v705_v31 = vmul.f32 %v641_v13, %v641_v13 }
  0xf9   :  { %v764_v14 = vadd.f32 %v1184_v32, %v704_v30 }
  0xfa   :  { %v1192_v38 = vpop.f32.mrf.mxu2  ;;  %v795_v15 = vadd.f32 %v1186_v33, %v705_v31  ;;  %v529_v33 = vld [vmem:[#allocation2 + $0xd8] sm:$0xff] }
  0xfb   :  { %v1194_v39 = vpop.f32.mrf.mxu3 }
  0xfc   :  { %v348_v40 = vpop.f32.mrf.mxu0 }
  0xfd   :  { %v437_v41 = vpop.f32.mrf.mxu1  ;;  %v642_v20 = vsub.f32 %v348_v40, %v578_v6  ;;  %v586_v6 = vmul.f32 128.0, %v522_v36 }
  0xfe   :  { %v643_v21 = vsub.f32 %v437_v41, %v579_v7  ;;  %v587_v7 = vmul.f32 128.0, %v523_v37 }
  0xff   :  { %v706_v4 = vmul.f32 %v642_v20, %v642_v20 }
 0x100   :  { %v707_v5 = vmul.f32 %v643_v21, %v643_v21 }
 0x101   :  { %v765_v20 = vadd.f32 %v764_v14, %v706_v4  ;;  %v534_v14 = vld [vmem:[#allocation2 + $0x100] sm:$0xff] }
 0x102   :  { %v1196_v46 = vpop.f32.mrf.mxu2  ;;  %v796_v21 = vadd.f32 %v795_v15, %v707_v5 }
 0x103   :  { %v1198_v47 = vpop.f32.mrf.mxu3 }
 0x104   :  { %v350_v42 = vpop.f32.mrf.mxu0 }
 0x105   :  { %v439_v43 = vpop.f32.mrf.mxu1  ;;  %v644_v62 = vsub.f32 %v350_v42, %v580_v16  ;;  %v526_v42 = vld [vmem:[#allocation2 + $0xc0] sm:$0xff] }
 0x106   :  { %v645_v63 = vsub.f32 %v439_v43, %v581_v17  ;;  %v527_v43 = vld [vmem:[#allocation2 + $0xc8] sm:$0xff]  ;;  %v590_v30 = vmul.f32 128.0, %v526_v42 }
 0x107   :  { %v708_v12 = vmul.f32 %v644_v62, %v644_v62  ;;  %v591_v31 = vmul.f32 128.0, %v527_v43  ;;  %v530_v62 = vld [vmem:[#allocation2 + $0xe0] sm:$0xff] }
 0x108   :  { %v709_v13 = vmul.f32 %v645_v63, %v645_v63 }
 0x10a   :  { %v1200_v50 = vpop.f32.mrf.mxu2 }
 0x10b   :  { %v1202_v51 = vpop.f32.mrf.mxu3 }
 0x10c   :  { %v353_v48 = vpop.f32.mrf.mxu0 }
 0x10d   :  { %v442_v49 = vpop.f32.mrf.mxu1  ;;  %v646_v40 = vsub.f32 %v353_v48, %v582_v26  ;;  %v588_v48 = vmul.f32 128.0, %v524_v8 }
 0x10e   :  { %v647_v41 = vsub.f32 %v442_v49, %v583_v27  ;;  %v589_v49 = vmul.f32 128.0, %v525_v9  ;;  %v528_v27 = vld [vmem:[#allocation2 + $0xd0] sm:$0xff] }
 0x10f   :  { %v710_v22 = vmul.f32 %v646_v40, %v646_v40  ;;  %v592_v5 = vmul.f32 128.0, %v528_v27 }
 0x110   :  { %v711_v23 = vmul.f32 %v647_v41, %v647_v41 }
 0x112   :  { %v1204_v54 = vpop.f32.mrf.mxu2 }
 0x113   :  { %v1206_v55 = vpop.f32.mrf.mxu3 }
 0x114   :  { %v355_v52 = vpop.f32.mrf.mxu0 }
 0x115   :  { %v444_v53 = vpop.f32.mrf.mxu1 }
 0x11a   :  { %v1212_v58 = vpop.f32.mrf.mxu2 }
 0x11b   :  { %v1214_v59 = vpop.f32.mrf.mxu3 }
 0x11c   :  { %v1208_v56 = vpop.f32.mrf.mxu0 }
 0x11d   :  { %v1210_v57 = vpop.f32.mrf.mxu1  ;;  %v650_v26 = vsub.f32 %v1208_v56, %v586_v6 }
 0x11e   :  { %v651_v32 = vsub.f32 %v1210_v57, %v587_v7  ;;  %v593_v57 = vmul.f32 128.0, %v529_v33 }
 0x11f   :  { %v714_v6 = vmul.f32 %v650_v26, %v650_v26  ;;  %v536_v26 = vld [vmem:[#allocation2 + $0x110] sm:$0xff] }
 0x120   :  { %v715_v7 = vmul.f32 %v651_v32, %v651_v32 }
 0x122   :  { %v1224_v28 = vpop.f32.mrf.mxu2 }
 0x123   :  { %1283 = vst [vmem:[#allocation12_spill] sm:$0xff] %v1224_v28  ;;  %v1226_v29 = vpop.f32.mrf.mxu3  ;;  %v649_v28 = vsub.f32 %v444_v53, %v585_v3  ;;  %v797_v53 = vadd.f32 %v796_v21, %v709_v13 }
 0x124   :  { %v1216_v0 = vpop.f32.mrf.mxu0  ;;  %1284 = vst [vmem:[#allocation13_spill] sm:$0xff] %v1226_v29  ;;  %v648_v29 = vsub.f32 %v355_v52, %v584_v2  ;;  %v766_v52 = vadd.f32 %v765_v20, %v708_v12  ;;  %v531_v2 = vld [vmem:[#allocation2 + $0xe8] sm:$0xff] }
 0x125   :  { %v1218_v1 = vpop.f32.mrf.mxu1  ;;  %v713_v37 = vmul.f32 %v649_v28, %v649_v28  ;;  %v652_v4 = vsub.f32 %v1216_v0, %v588_v48  ;;  %v798_v41 = vadd.f32 %v797_v53, %v711_v23  ;;  %v595_v9 = vmul.f32 128.0, %v531_v2  ;;  %v535_v0 = vld [vmem:[#allocation2 + $0x108] sm:$0xff]  ;;  %v532_v48 = vld [vmem:[#allocation2 + $0xf0] sm:$0xff] }
 0x126   :  { %v712_v36 = vmul.f32 %v648_v29, %v648_v29  ;;  %v653_v56 = vsub.f32 %v1218_v1, %v589_v49  ;;  %v767_v40 = vadd.f32 %v766_v52, %v710_v22  ;;  %v594_v29 = vmul.f32 128.0, %v530_v62  ;;  %v533_v49 = vld [vmem:[#allocation2 + $0xf8] sm:$0xff] }
 0x127   :  { %v799_v12 = vadd.f32 %v798_v41, %v713_v37  ;;  %v716_v43 = vmul.f32 %v652_v4, %v652_v4  ;;  %v596_v52 = vmul.f32 128.0, %v532_v48  ;;  %v597_v53 = vmul.f32 128.0, %v533_v49  ;;  %v539_v37 = vld [vmem:[#allocation2 + $0x128] sm:$0xff]  ;;  %v541_v41 = vld [vmem:[#allocation2 + $0x138] sm:$0xff] }
 0x128   :  { %v768_v15 = vadd.f32 %v767_v40, %v712_v36  ;;  %v717_v1 = vmul.f32 %v653_v56, %v653_v56  ;;  %v538_v36 = vld [vmem:[#allocation2 + $0x120] sm:$0xff]  ;;  %v600_v4 = vmul.f32 128.0, %v536_v26  ;;  %v540_v40 = vld [vmem:[#allocation2 + $0x130] sm:$0xff] }
 0x129   :  { %v800_v23 = vadd.f32 %v799_v12, %v715_v7  ;;  %v544_v26 = vld [vmem:[#allocation2 + $0x150] sm:$0xff] }
 0x12a   :  { %v1232_v63 = vpop.f32.mrf.mxu2  ;;  %v769_v22 = vadd.f32 %v768_v15, %v714_v6  ;;  %v603_v15 = vmul.f32 128.0, %v539_v37  ;;  %v664_v48 = vsub.f32 %v1172_v60, %v600_v4  ;;  %v547_v60 = vld [vmem:[#allocation2 + $0x168] sm:$0xff] }
 0x12b   :  { %v1234_v3 = vpop.f32.mrf.mxu3  ;;  %v801_v2 = vadd.f32 %v800_v23, %v717_v1  ;;  %v605_v23 = vmul.f32 128.0, %v541_v41  ;;  %v549_v41 = vld [vmem:[#allocation2 + $0x178] sm:$0xff] }
 0x12c   :  { %v1220_v18 = vpop.f32.mrf.mxu0  ;;  %v770_v62 = vadd.f32 %v769_v22, %v716_v43  ;;  %v604_v22 = vmul.f32 128.0, %v540_v40  ;;  %v548_v40 = vld [vmem:[#allocation2 + $0x170] sm:$0xff] }
 0x12d   :  { %v1222_v19 = vpop.f32.mrf.mxu1  ;;  %v654_v8 = vsub.f32 %v1220_v18, %v590_v30  ;;  %v537_v18 = vld [vmem:[#allocation2 + $0x118] sm:$0xff]  ;;  %v598_v30 = vmul.f32 128.0, %v534_v14  ;;  %v602_v14 = vmul.f32 128.0, %v538_v36 }
 0x12e   :  { %v655_v28 = vsub.f32 %v1222_v19, %v591_v31  ;;  %v599_v31 = vmul.f32 128.0, %v535_v0  ;;  %v601_v56 = vmul.f32 128.0, %v537_v18  ;;  %v543_v0 = vld [vmem:[#allocation2 + $0x148] sm:$0xff]  ;;  %v668_v4 = vsub.f32 %v1180_v24, %v604_v22 }
 0x12f   :  { %v718_v32 = vmul.f32 %v654_v8, %v654_v8  ;;  %v666_v36 = vsub.f32 %v1176_v10, %v602_v14 }
 0x130   :  { %v719_v19 = vmul.f32 %v655_v28, %v655_v28  ;;  %v665_v49 = vsub.f32 %v1174_v61, %v601_v56  ;;  %v669_v56 = vsub.f32 %v1182_v25, %v605_v23 }
 0x131   :  { %v771_v6 = vadd.f32 %v770_v62, %v718_v32  ;;  %v728_v62 = vmul.f32 %v664_v48, %v664_v48  ;;  %v730_v14 = vmul.f32 %v666_v36, %v666_v36 }
 0x132   :  { %v802_v7 = vadd.f32 %v801_v2, %v719_v19  ;;  %v729_v2 = vmul.f32 %v665_v49, %v665_v49 }
 0x134   :  { %v365_v16 = vpop.f32.mrf.mxu0 }
 0x135   :  { %v454_v17 = vpop.f32.mrf.mxu1  ;;  %v656_v20 = vsub.f32 %v365_v16, %v592_v5  ;;  %v1240_v5 = vpop.f32.mrf.mxu2 }
 0x136   :  { %v657_v21 = vsub.f32 %v454_v17, %v593_v57  ;;  %v1242_v57 = vpop.f32.mrf.mxu3 }
 0x137   :  { %v720_v16 = vmul.f32 %v656_v20, %v656_v20 }
 0x138   :  { %v721_v17 = vmul.f32 %v657_v21, %v657_v21 }
 0x139   :  { %v772_v43 = vadd.f32 %v771_v6, %v720_v16  ;;  %v608_v16 = vmul.f32 128.0, %v544_v26  ;;  %v552_v26 = vld [vmem:[#allocation2 + $0x190] sm:$0xff] }
 0x13a   :  { %v803_v1 = vadd.f32 %v802_v7, %v721_v17  ;;  %v616_v36 = vmul.f32 128.0, %v552_v26 }
 0x13b   :  { %v672_v25 = vsub.f32 %v1192_v38, %v608_v16 }
 0x13c   :  { %v368_v13 = vpop.f32.mrf.mxu0 }
 0x13d   :  { %v457_v42 = vpop.f32.mrf.mxu1  ;;  %v658_v27 = vsub.f32 %v368_v13, %v594_v29  ;;  %v662_v29 = vsub.f32 %v1168_v44, %v598_v30  ;;  %v545_v44 = vld [vmem:[#allocation2 + $0x158] sm:$0xff] }
 0x13e   :  { %v659_v33 = vsub.f32 %v457_v42, %v595_v9  ;;  %v663_v9 = vsub.f32 %v1170_v45, %v599_v31  ;;  %v542_v42 = vld [vmem:[#allocation2 + $0x140] sm:$0xff]  ;;  %v607_v31 = vmul.f32 128.0, %v543_v0  ;;  %v609_v17 = vmul.f32 128.0, %v545_v44  ;;  %v553_v44 = vld [vmem:[#allocation2 + $0x198] sm:$0xff] }
 0x13f   :  { %v722_v8 = vmul.f32 %v658_v27, %v658_v27  ;;  %v726_v27 = vmul.f32 %v662_v29, %v662_v29  ;;  %v606_v30 = vmul.f32 128.0, %v542_v42  ;;  %v1254_v29 = vpop.f32.mrf.mxu2  ;;  %v612_v42 = vmul.f32 128.0, %v548_v40 }
 0x140   :  { %v723_v28 = vmul.f32 %v659_v33, %v659_v33  ;;  %v727_v33 = vmul.f32 %v663_v9, %v663_v9  ;;  %v1256_v9 = vpop.f32.mrf.mxu3  ;;  %v613_v0 = vmul.f32 128.0, %v549_v41 }
 0x141   :  { %v773_v18 = vadd.f32 %v772_v43, %v722_v8  ;;  %v670_v10 = vsub.f32 %v1188_v34, %v606_v30  ;;  %v550_v43 = vld [vmem:[#allocation2 + $0x180] sm:$0xff]  ;;  %v551_v34 = vld [vmem:[#allocation2 + $0x188] sm:$0xff]  ;;  %v676_v30 = vsub.f32 %v1200_v50, %v612_v42 }
 0x142   :  { %v804_v45 = vadd.f32 %v803_v1, %v723_v28  ;;  %v611_v28 = vmul.f32 128.0, %v547_v60  ;;  %v732_v1 = vmul.f32 %v668_v4, %v668_v4  ;;  %v615_v38 = vmul.f32 128.0, %v551_v34  ;;  %v559_v50 = vld [vmem:[#allocation2 + $0x1c8] sm:$0xff] }
 0x143   :  { %v734_v48 = vmul.f32 %v670_v10, %v670_v10  ;;  %v740_v41 = vmul.f32 %v676_v30, %v676_v30 }
 0x144   :  { %v370_v12 = vpop.f32.mrf.mxu0  ;;  %v675_v23 = vsub.f32 %v1198_v47, %v611_v28 }
 0x145   :  { %v459_v13 = vpop.f32.mrf.mxu1  ;;  %v660_v20 = vsub.f32 %v370_v12, %v596_v52  ;;  %v667_v52 = vsub.f32 %v1178_v11, %v603_v15  ;;  %v671_v11 = vsub.f32 %v1190_v35, %v607_v31  ;;  %v733_v35 = vmul.f32 %v669_v56, %v669_v56  ;;  %v558_v56 = vld [vmem:[#allocation2 + $0x1c0] sm:$0xff] }
 0x146   :  { %v661_v21 = vsub.f32 %v459_v13, %v597_v53  ;;  %v546_v53 = vld [vmem:[#allocation2 + $0x160] sm:$0xff]  ;;  %v673_v13 = vsub.f32 %v1194_v39, %v609_v17  ;;  %v555_v39 = vld [vmem:[#allocation2 + $0x1a8] sm:$0xff]  ;;  %v677_v31 = vsub.f32 %v1202_v51, %v613_v0  ;;  %v679_v17 = vsub.f32 %v1206_v55, %v615_v38 }
 0x147   :  { %v724_v32 = vmul.f32 %v660_v20, %v660_v20  ;;  %v610_v8 = vmul.f32 128.0, %v546_v53  ;;  %v731_v15 = vmul.f32 %v667_v52, %v667_v52  ;;  %v735_v49 = vmul.f32 %v671_v11, %v671_v11  ;;  %v556_v53 = vld [vmem:[#allocation2 + $0x1b0] sm:$0xff]  ;;  %v408_v10 = vpop.f32.mrf.mxu2 }
 0x148   :  { %v725_v19 = vmul.f32 %v661_v21, %v661_v21  ;;  %v617_v52 = vmul.f32 128.0, %v553_v44  ;;  %v741_v51 = vmul.f32 %v677_v31, %v677_v31  ;;  %v497_v11 = vpop.f32.mrf.mxu3  ;;  %v622_v42 = vmul.f32 128.0, %v558_v56 }
 0x149   :  { %v774_v37 = vadd.f32 %v773_v18, %v724_v32  ;;  %v674_v22 = vsub.f32 %v1196_v46, %v610_v8  ;;  %v614_v18 = vmul.f32 128.0, %v550_v43  ;;  %v557_v46 = vld [vmem:[#allocation2 + $0x1b8] sm:$0xff]  ;;  %v680_v8 = vsub.f32 %v1212_v58, %v616_v36 }
 0x14a   :  { %v805_v61 = vadd.f32 %v804_v45, %v725_v19  ;;  %v554_v45 = vld [vmem:[#allocation2 + $0x1a0] sm:$0xff]  ;;  %v681_v28 = vsub.f32 %v1214_v59, %v617_v52  ;;  %v623_v0 = vmul.f32 128.0, %v559_v50  ;;  %v743_v34 = vmul.f32 %v679_v17, %v679_v17 }
 0x14b   :  { %v775_v6 = vadd.f32 %v774_v37, %v726_v27  ;;  %v736_v27 = vmul.f32 %v672_v25, %v672_v25  ;;  %v738_v37 = vmul.f32 %v674_v22, %v674_v22  ;;  %v678_v16 = vsub.f32 %v1204_v54, %v614_v18  ;;  %v561_v54 = vld [vmem:[#allocation2 + $0x1d8] sm:$0xff] }
 0x14c   :  { %v806_v7 = vadd.f32 %v805_v61, %v727_v33  ;;  %v737_v33 = vmul.f32 %v673_v13, %v673_v13  ;;  %v739_v61 = vmul.f32 %v675_v23, %v675_v23  ;;  %v1286_v25 = vld [vmem:[#allocation13_spill] sm:$0xff]  ;;  %v625_v59 = vmul.f32 128.0, %v561_v54 }
 0x14d   :  { %v776_v12 = vadd.f32 %v775_v6, %v728_v62  ;;  %v618_v62 = vmul.f32 128.0, %v554_v45  ;;  %v620_v6 = vmul.f32 128.0, %v556_v53  ;;  %v742_v43 = vmul.f32 %v678_v16, %v678_v16 }
 0x14e   :  { %v807_v24 = vadd.f32 %v806_v7, %v729_v2  ;;  %v619_v2 = vmul.f32 128.0, %v555_v39  ;;  %v621_v7 = vmul.f32 128.0, %v557_v46  ;;  %v744_v22 = vmul.f32 %v680_v8, %v680_v8 }
 0x14f   :  { %v777_v20 = vadd.f32 %v776_v12, %v730_v14  ;;  %v560_v12 = vld [vmem:[#allocation2 + $0x1d0] sm:$0xff]  ;;  %v745_v23 = vmul.f32 %v681_v28, %v681_v28  ;;  %v686_v45 = vsub.f32 %v1240_v5, %v622_v42  ;;  %v687_v39 = vsub.f32 %v1242_v57, %v623_v0 }
 0x150   :  { %v808_v21 = vadd.f32 %v807_v24, %v731_v15  ;;  %v1285_v24 = vld [vmem:[#allocation12_spill] sm:$0xff]  ;;  %v683_v13 = vsub.f32 %v1286_v25, %v619_v2  ;;  %v685_v58 = vsub.f32 %v1234_v3, %v621_v7  ;;  %v689_v52 = vsub.f32 %v1256_v9, %v625_v59  ;;  %v499_v57 = vpop.f32.mrf.mxu3 }
 0x151   :  { %v778_v32 = vadd.f32 %v777_v20, %v732_v1  ;;  %v682_v55 = vsub.f32 %v1285_v24, %v618_v62  ;;  %v684_v20 = vsub.f32 %v1232_v63, %v620_v6  ;;  %v751_v5 = vmul.f32 %v687_v39, %v687_v39 }
 0x152   :  { %v809_v19 = vadd.f32 %v808_v21, %v733_v35  ;;  %v624_v21 = vmul.f32 128.0, %v560_v12  ;;  %v747_v38 = vmul.f32 %v683_v13, %v683_v13  ;;  %v749_v31 = vmul.f32 %v685_v58, %v685_v58 }
 0x153   :  { %v779_v60 = vadd.f32 %v778_v32, %v734_v48  ;;  %v562_v48 = vld [vmem:[#allocation2 + $0x1e0] sm:$0xff]  ;;  %v746_v18 = vmul.f32 %v682_v55, %v682_v55  ;;  %v564_v32 = vld [vmem:[#allocation2 + $0x1f0] sm:$0xff]  ;;  %v748_v30 = vmul.f32 %v684_v20, %v684_v20  ;;  %v753_v56 = vmul.f32 %v689_v52, %v689_v52 }
 0x154   :  { %v810_v47 = vadd.f32 %v809_v19, %v735_v49  ;;  %v563_v49 = vld [vmem:[#allocation2 + $0x1e8] sm:$0xff]  ;;  %v565_v19 = vld [vmem:[#allocation2 + $0x1f8] sm:$0xff]  ;;  %v688_v36 = vsub.f32 %v1254_v29, %v624_v21 }
 0x155   :  { %v780_v4 = vadd.f32 %v779_v60, %v736_v27  ;;  %v627_v3 = vmul.f32 128.0, %v563_v49  ;;  %v628_v60 = vmul.f32 128.0, %v564_v32 }
 0x156   :  { %v811_v40 = vadd.f32 %v810_v47, %v737_v33  ;;  %v626_v33 = vmul.f32 128.0, %v562_v48  ;;  %v629_v47 = vmul.f32 128.0, %v565_v19 }
 0x157   :  { %v781_v14 = vadd.f32 %v780_v4, %v738_v37  ;;  %v750_v37 = vmul.f32 %v686_v45, %v686_v45  ;;  %v691_v17 = vsub.f32 %v497_v11, %v627_v3  ;;  %v752_v4 = vmul.f32 %v688_v36, %v688_v36 }
 0x158   :  { %v812_v15 = vadd.f32 %v811_v40, %v739_v61  ;;  %v410_v61 = vpop.f32.mrf.mxu2  ;;  %v690_v16 = vsub.f32 %v408_v10, %v626_v33  ;;  %v693_v29 = vsub.f32 %v499_v57, %v629_v47 }
 0x159   :  { %v782_v1 = vadd.f32 %v781_v14, %v740_v41  ;;  %v692_v41 = vsub.f32 %v410_v61, %v628_v60  ;;  %v755_v7 = vmul.f32 %v691_v17, %v691_v17 }
 0x15a   :  { %v813_v35 = vadd.f32 %v812_v15, %v741_v51  ;;  %v754_v6 = vmul.f32 %v690_v16, %v690_v16  ;;  %v757_v15 = vmul.f32 %v693_v29, %v693_v29 }
 0x15b   :  { %v783_v26 = vadd.f32 %v782_v1, %v742_v43  ;;  %v756_v14 = vmul.f32 %v692_v41, %v692_v41 }
 0x15c   :  { %v814_v44 = vadd.f32 %v813_v35, %v743_v34 }
 0x15d   :  { %v784_v27 = vadd.f32 %v783_v26, %v744_v22 }
 0x15e   :  { %v815_v63 = vadd.f32 %v814_v44, %v745_v23 }
 0x15f   :  { %v785_v53 = vadd.f32 %v784_v27, %v746_v18 }
 0x160   :  { %v816_v46 = vadd.f32 %v815_v63, %v747_v38 }
 0x161   :  { %v786_v62 = vadd.f32 %v785_v53, %v748_v30 }
 0x162   :  { %v817_v2 = vadd.f32 %v816_v46, %v749_v31 }
 0x163   :  { %v787_v40 = vadd.f32 %v786_v62, %v750_v37 }
 0x164   :  { %v818_v50 = vadd.f32 %v817_v2, %v751_v5 }
 0x165   :  { %v788_v51 = vadd.f32 %v787_v40, %v752_v4 }
 0x166   :  { %v819_v9 = vadd.f32 %v818_v50, %v753_v56 }
 0x167   :  { %v789_v8 = vadd.f32 %v788_v51, %v754_v6 }
 0x168   :  { %v820_v28 = vadd.f32 %v819_v9, %v755_v7 }
 0x169   :  { %v790_v12 = vadd.f32 %v789_v8, %v756_v14 }
 0x16a   :  { %v821_v54 = vadd.f32 %v820_v28, %v757_v15 }
 0x16b   :  { %824 = vst [vmem:[#allocation8] sm:$0xff] %v790_v12 }
 0x16c   :  { %825 = vst [vmem:[#allocation8 + $0x8] sm:$0xff] %v821_v54 }
 0x16d   :  { %836 = dma.vmem_to_hbm [thread:$0]  %s832_s2, 256, %s834_s5, [#allocation4]  }
 0x16e   :  { %1129 = dma.done.wait [#allocation4], 256  }
 0x16f   :  { %1130 = vsyncadd [#allocation4], 4294967040 }
 0x170   :  { %841 = vsyncpa [#allocation3], 1 }
 0x171   :  { %842 = vsyncpa [#allocation6], 1 }
 0x172   :  { %843 = vsyncpa [#allocation4], 1 }

</bundles_post_ra>
